<compile_context>
chip_gen: v5e
topology: v5e:2x2
jax: 0.10.0
libtpu: 0.0.40
codegen_flags: <defaults>
</compile_context>

<pallas_src>
import math

import jax
import jax.numpy as jnp
import numpy as np
from jax.experimental import pallas as pl
from jax.experimental.pallas import tpu as pltpu


def create_dct(n_mfcc: int, n_mels: int, norm: str = "ortho") -> jnp.ndarray:
    """Replicates torchaudio.functional.create_dct. Returns (n_mels, n_mfcc) f32."""
    n = np.arange(n_mels, dtype=np.float64)
    k = np.arange(n_mfcc, dtype=np.float64)[:, None]
    dct = np.cos(math.pi / n_mels * (n + 0.5) * k)          # (n_mfcc, n_mels)
    if norm is None:
        dct *= 2.0
    else:
        assert norm == "ortho"
        dct[0] *= 1.0 / math.sqrt(2.0)
        dct *= math.sqrt(2.0 / n_mels)
    return jnp.asarray(dct.T, dtype=jnp.float32)             # (n_mels, n_mfcc)


def _round_up(x: int, m: int) -> int:
    return ((x + m - 1) // m) * m


def _default_max_t_tile() -> int:
    """Gen-specific lane-tile so DMA per grid step dwarfs the ~0.35us step cost."""
    try:
        kind = jax.devices()[0].device_kind.lower()
    except Exception:
        kind = ""
    if "v7" in kind:
        return 8192        # ~3.9 MB/step at 3.2 TB/s HBM
    if "v5" in kind:
        return 2048        # keep double-buffered footprint small on v5e
    return 2048            # v6e and unknown


def _mfcc_kernel(w_ref, x_ref, o_ref):
    # w_ref: (n_mfcc, n_mels)   pre-transposed DCT matrix (lane-dense weight)
    # x_ref: (1, n_mels, Tt)    mel tile, time on the lane axis
    # o_ref: (1, n_mfcc, Tt)    MFCC tile
    o_ref[0] = jnp.dot(
        w_ref[...], x_ref[0],
        preferred_element_type=jnp.float32,
    ).astype(o_ref.dtype)


def mfcc(mel_specgram: jnp.ndarray, dct_mat: jnp.ndarray, *, max_t_tile: int | None = None):
    """mel_specgram: (B, n_mels, T) or (n_mels, T). dct_mat: (n_mels, n_mfcc)."""
    unsqueezed = mel_specgram.ndim == 2
    x = mel_specgram[None] if unsqueezed else mel_specgram
    B, n_mels, T = x.shape
    n_mels_w, n_mfcc = dct_mat.shape
    assert n_mels_w == n_mels, (n_mels_w, n_mels)

    # Pre-transpose the weight once in the wrapper: (n_mfcc, n_mels).
    w = jnp.transpose(dct_mat, (1, 0)).astype(jnp.float32)

    # Time-axis tiling: always a 128-lane multiple (the (8,128) rule applies to
    # the block_shape, not the array dim). Trailing partial block's stores are
    # masked by Pallas; pad-lane garbage cannot contaminate valid columns since
    # each output column depends only on its own input column.
    if max_t_tile is None:
        max_t_tile = _default_max_t_tile()
    max_t_tile = max(128, _round_up(int(max_t_tile), 128))

    t_pad = _round_up(T, 128)
    t_tile = min(max_t_tile, t_pad)
    # Guarantee >=2 grid steps along a 'parallel' axis when possible (v7x 2 TCs).
    if B * pl.cdiv(T, t_tile) < 2 and t_pad >= 256:
        t_tile = _round_up(pl.cdiv(t_pad, 2), 128)
    grid_t = pl.cdiv(T, t_tile)

    # Derive the VMEM budget from the chosen tile (weight + double-buffered
    # input + double-buffered output) with headroom, so bigger tiles aren't
    # silently clipped by the default scoped limit. Capped for v7x (64 MiB).
    elt = 4  # f32
    tile_bytes = elt * (n_mfcc * n_mels
                        + 2 * n_mels * t_tile     # input, double-buffered
                        + 2 * n_mfcc * t_tile)    # output, double-buffered
    vmem_limit = int(min(64 << 20, max(2 * tile_bytes + (2 << 20), 16 << 20)))

    out = pl.pallas_call(
        _mfcc_kernel,
        out_shape=jax.ShapeDtypeStruct((B, n_mfcc, T), x.dtype),
        grid_spec=pltpu.PrefetchScalarGridSpec(
            num_scalar_prefetch=0,
            grid=(B, grid_t),
            in_specs=[
                pl.BlockSpec((n_mfcc, n_mels), lambda b, t: (0, 0)),
                pl.BlockSpec((1, n_mels, t_tile), lambda b, t: (b, 0, t)),
            ],
            out_specs=pl.BlockSpec((1, n_mfcc, t_tile), lambda b, t: (b, 0, t)),
        ),
        compiler_params=pltpu.CompilerParams(
            dimension_semantics=("parallel", "parallel"),
            vmem_limit_bytes=vmem_limit),
        cost_estimate=pl.CostEstimate(
            flops=2 * B * n_mfcc * n_mels * T,
            transcendentals=0,
            bytes_accessed=elt * (x.size + w.size + B * n_mfcc * T)),
    )(w, x)

    return out[0] if unsqueezed else out


def _reference(mel_specgram, dct_mat):
    unsqueezed = mel_specgram.ndim == 2
    x = mel_specgram[None] if unsqueezed else mel_specgram
    y = jnp.matmul(jnp.transpose(x, (0, 2, 1)), dct_mat)      # (B, T, n_mfcc)
    y = jnp.transpose(y, (0, 2, 1))                            # (B, n_mfcc, T)
    return y[0] if unsqueezed else y


if __name__ == "__main__":
    n_mfcc, n_mels = 40, 80            # module defaults
    key = jax.random.PRNGKey(0)
    k3d, k2d = jax.random.split(key, 2)

    dct_mat = create_dct(n_mfcc, n_mels, "ortho")              # (80, 40)

    # 3-D (batched) path; T not a multiple of 128 -> masked trailing block.
    B, T = 2, 192
    mel3 = jax.random.normal(k3d, (B, n_mels, T), jnp.float32)
    y3 = jax.block_until_ready(mfcc(mel3, dct_mat))
    y3_ref = _reference(mel3, dct_mat)
    assert y3.shape == y3_ref.shape == (B, n_mfcc, T), (y3.shape, y3_ref.shape)
    np.testing.assert_allclose(np.asarray(y3), np.asarray(y3_ref),
                               rtol=1e-5, atol=1e-5)

    # 2-D (unsqueezed) path; B==1 and T not a 128-multiple -> exercises the
    # "split into >=2 tiles" branch plus the masked partial block.
    T2 = 300
    mel2 = jax.random.normal(k2d, (n_mels, T2), jnp.float32)
    y2 = jax.block_until_ready(mfcc(mel2, dct_mat))
    y2_ref = _reference(mel2, dct_mat)
    assert y2.shape == y2_ref.shape == (n_mfcc, T2), (y2.shape, y2_ref.shape)
    np.testing.assert_allclose(np.asarray(y2), np.asarray(y2_ref),
                               rtol=1e-5, atol=1e-5)

    print("KERNEL_OK")
</pallas_src>

<mosaic_0001>
module attributes {stable_mosaic.version = 11 : i64} {
  func.func @_mfcc_kernel(%arg0: i32, %arg1: i32, %arg2: memref<40x80xf32, #tpu.memory_space<vmem>>, %arg3: memref<1x80x256xf32, #tpu.memory_space<vmem>>, %arg4: memref<1x40x256xf32, #tpu.memory_space<vmem>>) attributes {dimension_semantics = [#tpu.dimension_semantics<parallel>, #tpu.dimension_semantics<parallel>], iteration_bounds = array<i64: 2, 1>, scalar_prefetch = 0 : i64, scratch_operands = 0 : i64, tpu.core_type = #tpu.core_type<tc>, window_params = [{pipeline_mode = #tpu.pipeline_mode<synchronous>, transform_indices = @transform_0, window_bounds = array<i64: 40, 80>}, {transform_indices = @transform_1, window_bounds = array<i64: 1, 80, 256>}, {transform_indices = @transform_2, window_bounds = array<i64: 1, 40, 256>}]} {
    %c0 = arith.constant 0 : index
    %c0_0 = arith.constant 0 : index
    %0 = vector.load %arg2[%c0, %c0_0] : memref<40x80xf32, #tpu.memory_space<vmem>>, vector<40x80xf32>
    %c0_1 = arith.constant 0 : index
    %c0_2 = arith.constant 0 : index
    %c0_3 = arith.constant 0 : index
    %1 = vector.load %arg3[%c0_1, %c0_2, %c0_3] : memref<1x80x256xf32, #tpu.memory_space<vmem>>, vector<1x80x256xf32>
    %2 = vector.shape_cast %1 : vector<1x80x256xf32> to vector<80x256xf32>
    %cst = arith.constant dense<0.000000e+00> : vector<40x256xf32>
    %3 = tpu.matmul %0, %2, %cst {dimension_numbers = #tpu.dot_dimension_numbers<[1], [0], [0], [1], [0, 0, 1, 1], [], []>} : vector<40x80xf32>, vector<80x256xf32>, vector<40x256xf32> -> vector<40x256xf32>
    %c0_4 = arith.constant 0 : index
    %c0_5 = arith.constant 0 : index
    %c0_6 = arith.constant 0 : index
    %4 = vector.load %arg4[%c0_4, %c0_5, %c0_6] : memref<1x40x256xf32, #tpu.memory_space<vmem>>, vector<1x40x256xf32>
    %5 = vector.shape_cast %4 : vector<1x40x256xf32> to vector<40x256xf32>
    %6 = vector.shape_cast %3 : vector<40x256xf32> to vector<1x40x256xf32>
    tpu.vector_store %arg4[%c0_4, %c0_5, %c0_6], %6 {strides = array<i32>} : memref<1x40x256xf32, #tpu.memory_space<vmem>>, vector<1x40x256xf32>,
    return
  }
  func.func @transform_0(%arg0: i32, %arg1: i32) -> (i32, i32) {
    %c0_i32 = arith.constant 0 : i32
    %c0_i32_0 = arith.constant 0 : i32
    %c0_i32_1 = arith.constant 0 : i32
    return %c0_i32, %c0_i32_0 : i32, i32
  }
  func.func @transform_1(%arg0: i32, %arg1: i32) -> (i32, i32, i32) {
    %c0_i32 = arith.constant 0 : i32
    %c0_i32_0 = arith.constant 0 : i32
    return %arg0, %c0_i32, %arg1 : i32, i32, i32
  }
  func.func @transform_2(%arg0: i32, %arg1: i32) -> (i32, i32, i32) {
    %c0_i32 = arith.constant 0 : i32
    %c0_i32_0 = arith.constant 0 : i32
    return %arg0, %c0_i32, %arg1 : i32, i32, i32
  }
}

</mosaic_0001>

<bundles_post_ra>
// kernel: tpu_custom_call.1
= control target key start
LH: loop header
LB: loop body
LE: loop exit
PB: predicated region body
PF: predicated region fallthrough
CT: control target
= control target key end

     0   :  { %7 = vsyncpa [#allocation3], 0  ;;  %s904_s0 = inlined_call_operand.hbm [shape: f32[40,80], index: 0, kind: input, shape index: {}]   ;;  %s905_s1 = inlined_call_operand.hbm [shape: f32[2,80,192], index: 1, kind: input, shape index: {}]   ;;  %s906_s2 = inlined_call_operand.hbm [shape: f32[2,40,192], index: 2, kind: output, shape index: {}]  }
   0x1   :  { %8 = vsyncpa [#allocation6], 0 }
   0x2   :  { %10 = vsyncpa [#allocation6 + $0x1], 0 }
   0x3   :  { %11 = vsyncpa [#allocation4], 0 }
   0x4   :  { %13 = vsyncpa [#allocation4 + $0x1], 0  ;;  %s728_s9 = smov 0   ;;  %s730_s10 = smov 0  }
   0x5   :  { %s732_s11 = smov 0   ;;  %s734_s12 = smov 0  }
   0x6   :  { %s736_s13 = smov 0   ;;  %s738_s14 = smov 0  }
   0x7 LB: > { %s433_s15 = sadd.s32 4294967295, %s704_s14   ;;  %s434_s16 = sadd.s32 4294967294, %s704_s14   ;;  %s704_s14 = sphi %s738_s14, %s19_s14   ;;  %s700_s13 = sphi %s736_s13, %s917_s13   ;;  %s696_s12 = sphi %s734_s12, %s916_s12   ;;  %s692_s11 = sphi %s732_s11, %s915_s11   ;;  %s688_s10 = sphi %s730_s10, %s914_s10   ;;  %s684_s9 = sphi %s728_s9, %s913_s9  }
   0x8   : > { %p74_p0 = scmp.ne.s32.totalorder %s688_s10, %s684_s9  ;;  %p762_p1 = scmp.eq.s32.totalorder %s433_s15, 0 }
   0x9   : > { %p766_p2 = scmp.eq.s32.totalorder %s433_s15, 1  ;;  %p106_p3 = scmp.eq.s32.totalorder %s434_s16, 1 }
   0xa   : > { %p772_p4 = por %p762_p1, %p74_p0  ;;  %p435_p5 = scmp.ge.s32.totalorder %s704_s14, 1 }
   0xb   : > { %p777_p6 = por %p106_p3, %p74_p0  ;;  %p113_p7 = scmp.lt.s32.totalorder %s704_s14, 3 }
   0xc   : > { %s124_s23 = sshll.u32 %s904_s0, 4  ;;  %s706_s25 = smov [#allocation2]   ;;  %s125_s23 = int_to_ptr.hbm [resolvable:$true] %s124_s23 }
   0xd   : > { %p785_p8 = pnand %p435_p5, %p113_p7  ;;  %s126_s26 = sshll.u32 %s706_s25, 4  ;;  %s127_s26 = int_to_ptr.vmem [resolvable:$true] %s126_s26 }
   0xe   : > { %p437_p11 = scmp.ge.s32.totalorder %s704_s14, 2  ;;  %s707_s27 = smov 128  }
   0xf   : > { %p487_p9 = pneg %p785_p8  ;;  %s708_s28 = smov 8  }
  0x10   : > { %s31_s29 = sadd.s32 1, %s700_s13  ;;  %s61_s30 = sadd.s32 1, %s692_s11 }
  0x11   : > { %p488_p10 = pnand %p487_p9, %p762_p1  ;;  %p33_p12 = scmp.ge.s32.totalorder %s31_s29, 2 }
  0x12   : > { %p68_p13 = scmp.ne.s32.totalorder %s692_s11, %s688_s10  ;;  %p69_p0 = scmp.eq.s32.totalorder %s704_s14, 0 }
  0x13   : > { %490 = dma.hbm_to_vmem [thread:$0]  (!%p488_p10), %s125_s23, 640, %s127_s26, [#allocation3], %s707_s27, %s707_s27, %s708_s28  }
  0x14   : > { %s919_s29 = smov (%p33_p12, %s31_s29), 0  ;;  %p70_p3 = por %p69_p0, %p68_p13 }
  0x15   : > { %p803_p5 = por %p766_p2, %p68_p13  ;;  %s56_s4 = ssub.s32 %s700_s13, %s919_s29 }
  0x16   : > { %p500_p7 = scmp.lt.s32.totalorder %s704_s14, 2  ;;  %p59_p9 = scmp.eq.s32.totalorder %s56_s4, 0 }
  0x17   : > { %s140_s5 = sand.u32 1, %s692_s11   ;;  %s475_s8 = smul.u32 160, %s700_s13 }
  0x18   : > { %s474_s6 = smul.u32 160, %s140_s5  ;;  %p492_p10 = pnand %p500_p7, %p70_p3 }
  0x19   : > { %s812_s7 = scalar_select %p59_p9, %s692_s11, %s61_s30  }
  0x1a   : > { %s144_s15 = scalar_lea.vmem [#allocation5], %s474_s6  ;;  %s151_s23 = scalar_lea.hbm %s905_s1, %s475_s8 }
  0x1b   : > { %s154_s16 = sshll.u32 %s144_s15, 4  ;;  %s152_s18 = sshll.u32 %s151_s23, 4  ;;  %s155_s16 = int_to_ptr.vmem [resolvable:$true] %s154_s16  ;;  %s153_s18 = int_to_ptr.hbm [resolvable:$true] %s152_s18 }
  0x1c   : > { %s141_s25 = scalar_lea.sflag [#allocation6], %s140_s5  ;;  %s709_s26 = smov 256  }
  0x1d   : > { %s710_s27 = smov 16   ;;  %166 = sbr.rel (%p785_p8) target bundleno = 212 (0xd4), region = 28 }
  0x1e   : > { %494 = dma.hbm_to_vmem [thread:$0]  (!%p492_p10), %s153_s18, 2560, %s155_s16, %s141_s25, %s709_s26, %s709_s26, %s710_s27  }
  0x22   : > { %671 = dma.done.wait (%p762_p1), [#allocation3], 640  }
  0x23   : > { %673 = vsyncadd (%p762_p1), [#allocation3], 4294966656  ;;  %s825_s28 = sand.u32 1, %s688_s10  }
  0x24   : > { %s476_s30 = smul.u32 160, %s825_s28  ;;  %s174_s4 = scalar_lea.sflag [#allocation6], %s825_s28 }
  0x26   : > { %s829_s5 = scalar_lea.vmem [#allocation5], %s476_s30 }
  0x27   : > { %675 = dma.done.wait (%p772_p4), %s174_s4, 2560  }
  0x28   : > { %677 = vsyncadd (%p772_p4), %s174_s4, 4294964736  ;;  %v224_v0 = vld [vmem:[%s829_s5 + $0x90] sm:$0xff]  ;;  %v222_v1 = vld [vmem:[%s829_s5 + $0x80] sm:$0xff]  ;;  %vm226_vm0 = vcmask 654336   ;;  %s477_s17 = smul.u32 80, %s825_s28  ;;  %s317_s22 = scalar_lea.sflag [#allocation4], %s825_s28 }
  0x29   : > { %454 = vmatpush.msra.mxu2 %v224_v0  ;;  %v225_v2 = vld [vmem:[%s829_s5 + $0x98] sm:$0xff]  ;;  %248 = vmatpush.msra.mxu0 %v224_v0  ;;  %v220_v3 = vld [vmem:[%s829_s5 + $0x70] sm:$0xff]  ;;  %v223_v4 = vld [vmem:[%s829_s5 + $0x88] sm:$0xff]  ;;  %s478_s24 = smul.u32 80, %s696_s12  ;;  %s638_s26 = scalar_lea.hbm %s906_s2, 160 }
  0x2a   : > { %280 = vmatpush.msra.mxu1 %v225_v2  ;;  %464 = vmatpush.msra.mxu3 %v225_v2  ;;  %v221_v5 = vld [vmem:[%s829_s5 + $0x78] sm:$0xff]  ;;  %v218_v6 = vld [vmem:[%s829_s5 + $0x60] sm:$0xff]  ;;  %v219_v7 = vld [vmem:[%s829_s5 + $0x68] sm:$0xff]  ;;  %s198_s19 = scalar_lea.vmem [#allocation7], %s477_s17 }
  0x2b   : > { %455 = vmatpush.msra.mxu2 %v222_v1  ;;  %249 = vmatpush.msra.mxu0 %v222_v1  ;;  %v216_v8 = vld [vmem:[%s829_s5 + $0x50] sm:$0xff]  ;;  %v217_v9 = vld [vmem:[%s829_s5 + $0x58] sm:$0xff]  ;;  %v214_v10 = vld [vmem:[%s829_s5 + $0x40] sm:$0xff]  ;;  %s330_s15 = scalar_lea.hbm %s906_s2, %s478_s24  ;;  %s331_s16 = sshll.u32 %s198_s19, 4  ;;  %s332_s16 = int_to_ptr.vmem [resolvable:$true] %s331_s16 }
  0x2c   : > { %281 = vmatpush.msra.mxu1 %v223_v4  ;;  %465 = vmatpush.msra.mxu3 %v223_v4  ;;  %v215_v11 = vld [vmem:[%s829_s5 + $0x48] sm:$0xff]  ;;  %v212_v12 = vld [vmem:[%s829_s5 + $0x30] sm:$0xff]  ;;  %v213_v13 = vld [vmem:[%s829_s5 + $0x38] sm:$0xff]  ;;  %s333_s21 = sshll.u32 %s330_s15, 4  ;;  %s334_s21 = int_to_ptr.hbm [resolvable:$true] %s333_s21 }
  0x2d   : > { %456 = vmatpush.msra.mxu2 %v220_v3  ;;  %250 = vmatpush.msra.mxu0 %v220_v3  ;;  %v210_v14 = vld [vmem:[%s829_s5 + $0x20] sm:$0xff]  ;;  %v211_v15 = vld [vmem:[%s829_s5 + $0x28] sm:$0xff]  ;;  %v208_v16 = vld [vmem:[%s829_s5 + $0x10] sm:$0xff]  ;;  %s632_s12 = sshra.s32 %s334_s21, 4  ;;  %s633_s12 = int_to_ptr.hbm [resolvable:$true] %s632_s12 }
  0x2e   : > { %282 = vmatpush.msra.mxu1 %v221_v5  ;;  %466 = vmatpush.msra.mxu3 %v221_v5  ;;  %v209_v17 = vld [vmem:[%s829_s5 + $0x18] sm:$0xff]  ;;  %v206_v18 = vld [vmem:[%s829_s5] sm:$0xff]  ;;  %v203_v19 = vld [vmem:[#allocation2 + $0x10] sm:$0xff]  ;;  %s634_s23 = scalar_lea.hbm %s633_s12, 80  ;;  %p639_p8 = scmp.lt.s32.totalorder %s633_s12, %s906_s2 }
  0x2f   : > { %457 = vmatpush.msra.mxu2 %v218_v6  ;;  %251 = vmatpush.msra.mxu0 %v218_v6  ;;  %v207_v20 = vld [vmem:[%s829_s5 + $0x8] sm:$0xff]  ;;  %v201_v21 = vld [vmem:[#allocation2] sm:$0xff]  ;;  %v204_v22 = vld [vmem:[#allocation2 + $0x18] sm:$0xff]  ;;  %p635_p1 = scmp.ne.s32.totalorder %s633_s12, %s634_s23  ;;  %p640_p12 = scmp.lt.s32.totalorder %s638_s26, %s634_s23 }
  0x30   : > { %283 = vmatpush.msra.mxu1 %v219_v7  ;;  %467 = vmatpush.msra.mxu3 %v219_v7  ;;  %v202_v23 = vld [vmem:[#allocation2 + $0x8] sm:$0xff]  ;;  %v205_v24 = vld [vmem:[#allocation2 + $0x20] sm:$0xff] }
  0x31   : > { %458 = vmatpush.msra.mxu2 %v216_v8  ;;  %252 = vmatpush.msra.mxu0 %v216_v8  ;;  %p636_p2 = pnand %p635_p1, %p803_p5  ;;  %p641_p13 = por %p640_p12, %p639_p8 }
  0x32   : > { %284 = vmatpush.msra.mxu1 %v217_v9  ;;  %468 = vmatpush.msra.mxu3 %v217_v9 }
  0x33   : > { %459 = vmatpush.msra.mxu2 %v214_v10  ;;  %253 = vmatpush.msra.mxu0 %v214_v10  ;;  %p637_p4 = pneg %p636_p2 }
  0x34   : > { %285 = vmatpush.msra.mxu1 %v215_v11  ;;  %469 = vmatpush.msra.mxu3 %v215_v11 }
  0x35   : > { %460 = vmatpush.msra.mxu2 %v212_v12  ;;  %254 = vmatpush.msra.mxu0 %v212_v12  ;;  %p642_p0 = pnand %p641_p13, %p637_p4 }
  0x36   : > { %286 = vmatpush.msra.mxu1 %v213_v13  ;;  %470 = vmatpush.msra.mxu3 %v213_v13 }
  0x37   : > { %461 = vmatpush.msra.mxu2 %v210_v14  ;;  %255 = vmatpush.msra.mxu0 %v210_v14 }
  0x38   : > { %287 = vmatpush.msra.mxu1 %v211_v15  ;;  %471 = vmatpush.msra.mxu3 %v211_v15 }
  0x39   : > { %462 = vmatpush.msra.mxu2 %v208_v16  ;;  %256 = vmatpush.msra.mxu0 %v208_v16 }
  0x3a   : > { %288 = vmatpush.msra.mxu1 %v209_v17  ;;  %472 = vmatpush.msra.mxu3 %v209_v17 }
  0x3b   : > { %463 = vmatpush.msra.mxu2 %v206_v18  ;;  %257 = vmatpush.msra.mxu0 %v206_v18 }
  0x3c   : > { %443 = vmatmul.msk.f32.vlgmr.msra.gmra.mxu2 %vm226_vm0, %v203_v19  ;;  %289 = vmatpush.msra.mxu1 %v207_v20 }
  0x3d   : > { %446 = vmatmul.msk.f32.vlgmr.msra.gmra.mxu1 %vm226_vm0, %v201_v21  ;;  %473 = vmatpush.msra.mxu3 %v207_v20 }
  0x3e   : > { %449 = vmatmul.msk.f32.vlgmr.msra.gmra.mxu3 %vm226_vm0, %v204_v22  ;;  %441 = vmatmul.msk.f32.vlgmr.msra.gmra.mxu0 %vm226_vm0, %v201_v21 }
  0x44   : > { %444 = vmatmul.msk.f32.gmra.mxu2 %vm226_vm0, %v204_v22 }
  0x45   : > { %447 = vmatmul.msk.f32.gmra.mxu1 %vm226_vm0, %v202_v23 }
  0x46   : > { %450 = vmatmul.msk.f32.gmra.mxu3 %vm226_vm0, %v205_v24  ;;  %442 = vmatmul.msk.f32.gmra.mxu0 %vm226_vm0, %v202_v23 }
  0x4c   : > { %445 = vmatmul.msk.f32.gmra.mxu2 %vm226_vm0, %v205_v24 }
  0x4d   : > { %448 = vmatmul.msk.f32.gmra.mxu1 %vm226_vm0, %v203_v19 }
  0xba   : > { %v291_v25 = vpop.f32.mrf.mxu1 }
  0xbb   : > { %307 = vst [vmem:[%s198_s19 + $0x8] sm:$0xff] %v291_v25  ;;  %v259_v26 = vpop.f32.mrf.mxu0 }
  0xbc   : > { %306 = vst [vmem:[%s198_s19] sm:$0xff] %v259_v26 }
  0xbf   : > { %v265_v27 = vpop.f32.mrf.mxu2 }
  0xc0   : > { %310 = vst [vmem:[%s198_s19 + $0x20] sm:$0xff] %v265_v27 }
  0xc1   : > { %v300_v28 = vpop.f32.mrf.mxu3 }
  0xc2   : > { %v294_v29 = vpop.f32.mrf.mxu1  ;;  %313 = vst [vmem:[%s198_s19 + $0x38] sm:$0xff] %v300_v28 }
  0xc3   : > { %309 = vst [vmem:[%s198_s19 + $0x18] sm:$0xff] %v294_v29  ;;  %v262_v30 = vpop.f32.mrf.mxu0 }
  0xc4   : > { %308 = vst [vmem:[%s198_s19 + $0x10] sm:$0xff] %v262_v30 }
  0xc7   : > { %v268_v31 = vpop.f32.mrf.mxu2 }
  0xc8   : > { %312 = vst [vmem:[%s198_s19 + $0x30] sm:$0xff] %v268_v31 }
  0xc9   : > { %v303_v32 = vpop.f32.mrf.mxu3 }
  0xca   : > { %v297_v33 = vpop.f32.mrf.mxu1  ;;  %315 = vst [vmem:[%s198_s19 + $0x48] sm:$0xff] %v303_v32 }
  0xcb   : > { %311 = vst [vmem:[%s198_s19 + $0x28] sm:$0xff] %v297_v33 }
  0xcf   : > { %v271_v34 = vpop.f32.mrf.mxu2 }
  0xd0   : > { %314 = vst [vmem:[%s198_s19 + $0x40] sm:$0xff] %v271_v34 }
  0xd1   : > { %645 = shalt.err (!%p642_p0)
}
  0xd2   : > { %s711_s28 = smov 256   ;;  %s712_s4 = smov 16  }
  0xd3   : > { %485 = dma.vmem_to_hbm [thread:$0]  (%p803_p5), %s332_s16, 1280, %s334_s21, %s317_s22, %s711_s28, %s711_s28, %s712_s4  }
  0xd4 PF: > { %s348_s5 = sand.u32 1, %s684_s9   ;;  %p496_p3 = pnand %p437_p11, %p777_p6 }
  0xd5   : > { %s349_s17 = scalar_lea.sflag [#allocation4], %s348_s5 }
  0xd6   : > { %p497_p7 = pneg %p496_p3 }
  0xd8   : > { %679 = dma.done.wait (%p497_p7), %s349_s17, 1280  }
  0xd9   : > { %681 = vsyncadd (%p497_p7), %s349_s17, 4294966016  ;;  %s19_s14 = sadd.s32 1, %s704_s14   ;;  %s913_s9 = smov %s688_s10 }
  0xda   : > { %p16_p9 = scmp.ge.s32.totalorder %s19_s14, 4   ;;  %s914_s10 = smov %s692_s11 }
  0xdb   : > { %s915_s11 = smov %s812_s7  ;;  %s916_s12 = smov %s700_s13 }
  0xdc   : > { %s917_s13 = smov %s919_s29  ;;  %18 = sbr.rel (!%p16_p9) target bundleno = 7 (0x7), region = 78 }
  0xe1   :  { %355 = vsyncpa [#allocation3], 1 }
  0xe2   :  { %357 = vsyncpa [#allocation3 + $0x1], 1 }
  0xe3   :  { %358 = vsyncpa [#allocation6], 1 }
  0xe4   :  { %360 = vsyncpa [#allocation6 + $0x1], 1 }
  0xe5   :  { %361 = vsyncpa [#allocation4], 1 }
  0xe6   :  { %363 = vsyncpa [#allocation4 + $0x1], 1 }

</bundles_post_ra>
